<compile_context>
chip_gen: v7x
topology: tpu7x:2x2x1
jax: 0.10.0
libtpu: 0.0.40
codegen_flags: <defaults>
</compile_context>

<pallas_src>
import functools

import jax
import jax.numpy as jnp
from jax.experimental import pallas as pl
from jax.experimental.pallas import tpu as pltpu

_LANE = 128
_PALLAS_MIN_ELEMS = 1 << 18             # below ~256K elems, fused XLA beats kernel overhead
_VMEM_SOFT_BYTES = 14 * 1024 * 1024     # stay under v5e's 16 MiB scoped default w/o flags
_VMEM_HARD_BYTES = 44 * 1024 * 1024     # stay well under v7x's 64 MiB physical VMEM


def _noise_injection_kernel(sig_ref, noise_ref, w_ref, out_ref):
    # sig_ref / out_ref : (1, Ct, Tt)
    # noise_ref         : (1, 1, Tt) or (1, Ct, Tt) -- channel broadcast happens on the VPU
    # w_ref             : (Ct, 1)                   -- broadcasts over batch and time
    out_ref[...] = sig_ref[...] + w_ref[...] * noise_ref[...]


def _sublane_unit(dtype):
    # Minimum sublane multiple for sub-tiling at this dtype (f32:8, bf16:16, int8/fp8:32).
    return {4: 8, 2: 16, 1: 32}.get(jnp.dtype(dtype).itemsize, 8)


@functools.lru_cache(maxsize=1)
def _default_block_bytes():
    """Per-stream block budget, sized by VMEM generation."""
    try:
        vmem = int(pltpu.get_tpu_info().vmem_capacity_bytes)
    except Exception:
        vmem = 128 << 20
    # 64 MiB part (v7x): bigger blocks amortize the ~0.35us/step cost at 3.2 TB/s.
    # 128 MiB parts (v5e/v6e): 2 MiB already hides overhead and keeps the resident
    # footprint (~8 MiB double-buffered) under the v5e 16 MiB scoped default.
    return (4 << 20) if vmem <= (64 << 20) else (2 << 20)


def _pick_tiles(C, T, dtype, block_bytes):
    """Largest lane-dense (Ct, Tt) block respecting the (sublane,128)-or-full-dim rule,
    preferring a full contiguous time row (single linear DMA) before growing Ct."""
    itemsize = jnp.dtype(dtype).itemsize
    sub = _sublane_unit(dtype)
    budget = max(_LANE * sub, block_bytes // itemsize)

    if T % _LANE == 0:
        max_t = max(_LANE, ((budget // sub) // _LANE) * _LANE)
        Tt = T if T <= max_t else max_t
    else:
        Tt = T  # non-128-multiple T must be taken whole (block dim == full array dim)

    if C % sub == 0:
        Ct = min(C, max(sub, ((budget // Tt) // sub) * sub))
    else:
        Ct = C  # non-sublane-multiple C must be taken whole
    return Ct, Tt


def noise_injection(signal, noise, weight, *, block_bytes=None, donate_signal=False,
                    use_pallas=None):
    """signal: (B, C, T); weight: the module's (1, C, 1) parameter (any shape with C
    elements); noise: broadcastable to (B, C, T) (typically (B, 1, T)).

    donate_signal: set True only when signal's buffer is actually donated (and not
    reused afterwards); then the output aliases signal's HBM buffer.  Default False
    avoids the hidden defensive copy XLA inserts for non-donated aliased inputs.
    """
    signal = jnp.asarray(signal)
    B, C, T = signal.shape
    dtype = signal.dtype
    itemsize = jnp.dtype(dtype).itemsize

    noise = jnp.asarray(noise, dtype)
    weight = jnp.asarray(weight, dtype)

    if use_pallas is None:
        use_pallas = signal.size >= _PALLAS_MIN_ELEMS
    if not use_pallas:
        # Small layers: a fused XLA elementwise op is at least as fast as a kernel launch.
        return signal + weight.reshape(1, C, 1) * noise

    # ---- Normalize operands (no channel/batch broadcast materialized in HBM) ----
    w_col = weight.reshape(C, 1)

    if noise.ndim < 3:
        noise = noise.reshape((1,) * (3 - noise.ndim) + noise.shape)
    nB, nC, nT = noise.shape
    if nC not in (1, C):
        raise ValueError(f"noise channel dim {nC} not broadcastable to C={C}")
    if nB not in (1, B):
        raise ValueError(f"noise batch dim {nB} not broadcastable to B={B}")
    if nT == 1 and T != 1:
        noise = jnp.broadcast_to(noise, (nB, nC, T))  # rare edge case (time-constant noise)
        nT = T
    elif nT != T:
        raise ValueError(f"noise time dim {nT} not broadcastable to T={T}")

    if block_bytes is None:
        block_bytes = _default_block_bytes()

    sub = _sublane_unit(dtype)
    Ct, Tt = _pick_tiles(C, T, dtype, block_bytes)

    # Megacore: if the whole tensor collapsed into a single block, split once so the
    # second TensorCore (v7x) gets work.
    if B * pl.cdiv(C, Ct) * pl.cdiv(T, Tt) == 1:
        if Tt == T and T % (2 * _LANE) == 0:
            Tt = T // 2
        elif Ct == C and C % (2 * sub) == 0:
            Ct = C // 2

    # VMEM guard: the full-dim fallbacks (T % 128 != 0 or C % sublane != 0) can exceed
    # block_bytes.  Estimate the double-buffered resident footprint; raise the scoped
    # limit if needed, or fall back to XLA when it would not fit any generation safely.
    sig_blk = Ct * Tt * itemsize
    noise_blk = (Ct if nC == C else 1) * Tt * itemsize
    w_blk = Ct * itemsize
    resident = 2 * (2 * sig_blk + noise_blk + w_blk)   # 2x = double-buffering
    if resident > _VMEM_HARD_BYTES:
        return signal + weight.reshape(1, C, 1) * noise
    vmem_limit = None if resident <= _VMEM_SOFT_BYTES else int(resident + (4 << 20))

    n_ct = pl.cdiv(C, Ct)
    n_tt = pl.cdiv(T, Tt)
    nb_is_b = (nB == B)

    # Grid order: with single-channel noise and >1 channel tile, put the C-tile axis
    # innermost so the (1,1,Tt) noise block index is constant across consecutive steps
    # (fetched once per (b, ti) instead of C/Ct times).
    inner_c = (nC == 1 and n_ct > 1)
    if inner_c:
        grid = (B, n_tt, n_ct)
        sig_idx = lambda b, ti, ci: (b, ci, ti)
        w_idx = lambda b, ti, ci: (ci, 0)
        if nb_is_b:
            noise_idx = lambda b, ti, ci: (b, 0, ti)
        else:
            noise_idx = lambda b, ti, ci: (0, 0, ti)
    else:
        grid = (B, n_ct, n_tt)
        sig_idx = lambda b, ci, ti: (b, ci, ti)
        w_idx = lambda b, ci, ti: (ci, 0)
        noise_ci = (lambda ci: ci) if nC == C else (lambda ci: 0)
        if nb_is_b:
            noise_idx = lambda b, ci, ti: (b, noise_ci(ci), ti)
        else:
            noise_idx = lambda b, ci, ti: (0, noise_ci(ci), ti)

    noise_block = (1, Ct if nC == C else 1, Tt)

    sig_spec = pl.BlockSpec((1, Ct, Tt), sig_idx)
    noise_spec = pl.BlockSpec(noise_block, noise_idx)
    w_spec = pl.BlockSpec((Ct, 1), w_idx)
    out_spec = pl.BlockSpec((1, Ct, Tt), sig_idx)

    cp_kwargs = dict(dimension_semantics=("parallel", "parallel", "parallel"))
    if vmem_limit is not None:
        cp_kwargs["vmem_limit_bytes"] = vmem_limit

    return pl.pallas_call(
        _noise_injection_kernel,
        out_shape=jax.ShapeDtypeStruct((B, C, T), dtype),
        grid_spec=pltpu.PrefetchScalarGridSpec(
            num_scalar_prefetch=0,
            grid=grid,
            in_specs=[sig_spec, noise_spec, w_spec],
            out_specs=out_spec,
        ),
        compiler_params=pltpu.CompilerParams(**cp_kwargs),
        input_output_aliases=({0: 0} if donate_signal else {}),
    )(signal, noise, w_col)


if __name__ == "__main__":
    key = jax.random.PRNGKey(0)
    ks = jax.random.split(key, 8)

    # 1) Module-sized small case (B=2, C=4, T=16), per-sample single-channel noise.
    #    Pallas path forced (the wrapper would normally dispatch this tiny op to XLA).
    B, C, T = 2, 4, 16
    signal = jax.random.normal(ks[0], (B, C, T), dtype=jnp.float32)
    noise = jax.random.normal(ks[1], (B, 1, T), dtype=jnp.float32)
    weight0 = jnp.zeros((1, C, 1), dtype=jnp.float32)                       # module init
    weight1 = (jnp.arange(C, dtype=jnp.float32).reshape(1, C, 1) + 1.0) * 0.1

    ref0 = signal + weight0 * noise
    ref1 = signal + weight1 * noise
    out0 = jax.block_until_ready(noise_injection(signal, noise, weight0, use_pallas=True))
    out1 = jax.block_until_ready(noise_injection(signal, noise, weight1, use_pallas=True))
    assert jnp.allclose(out0, ref0, atol=1e-6), "mismatch (zero weight)"
    assert jnp.allclose(out1, ref1, atol=1e-6), "mismatch (nonzero weight)"

    # Auto-dispatch path (tiny shape -> fused XLA) should match too.
    out_auto = jax.block_until_ready(noise_injection(signal, noise, weight1))
    assert jnp.allclose(out_auto, ref1, atol=1e-6), "mismatch (XLA fallback path)"

    # 2) Multi-tile, single-channel noise, tiny block budget: exercises the
    #    (B, T-tiles, C-tiles) grid order and the in-kernel channel broadcast.
    B2, C2, T2 = 2, 32, 1024
    sig2 = jax.random.normal(ks[2], (B2, C2, T2), dtype=jnp.float32)
    noi2 = jax.random.normal(ks[3], (B2, 1, T2), dtype=jnp.float32)
    w2 = (jnp.arange(C2, dtype=jnp.float32).reshape(1, C2, 1) - 3.0) * 0.05
    ref2 = sig2 + w2 * noi2
    out2 = jax.block_until_ready(
        noise_injection(sig2, noi2, w2, block_bytes=16 * 1024, use_pallas=True))
    assert jnp.allclose(out2, ref2, atol=1e-6), "mismatch (tiled, single-channel noise)"

    # 3) Multi-tile, full-channel noise, with the opt-in signal->output alias.
    B3, C3, T3 = 2, 16, 512
    sig3 = jax.random.normal(ks[4], (B3, C3, T3), dtype=jnp.float32)
    noi3 = jax.random.normal(ks[5], (B3, C3, T3), dtype=jnp.float32)
    w3 = jnp.arange(C3, dtype=jnp.float32).reshape(1, C3, 1) * 0.02
    ref3 = sig3 + w3 * noi3
    out3 = jax.block_until_ready(
        noise_injection(sig3, noi3, w3, block_bytes=16 * 1024, use_pallas=True,
                        donate_signal=True))
    assert jnp.allclose(out3, ref3, atol=1e-6), "mismatch (tiled, full-channel, aliased)"

    # 4) Batch-shared (nB=1) noise: read directly via the index_map, no HBM broadcast.
    B4, C4, T4 = 2, 16, 512
    sig4 = jax.random.normal(ks[6], (B4, C4, T4), dtype=jnp.float32)
    noi4 = jax.random.normal(ks[7], (1, 1, T4), dtype=jnp.float32)
    w4 = jnp.arange(C4, dtype=jnp.float32).reshape(1, C4, 1) * 0.03
    ref4 = sig4 + w4 * noi4
    out4 = jax.block_until_ready(
        noise_injection(sig4, noi4, w4, block_bytes=16 * 1024, use_pallas=True))
    assert jnp.allclose(out4, ref4, atol=1e-6), "mismatch (batch-shared noise)"

    # 5) Non-128-multiple T (full-dim time block) path.
    B5, C5, T5 = 2, 8, 96
    sig5 = jax.random.normal(ks[0], (B5, C5, T5), dtype=jnp.float32)
    noi5 = jax.random.normal(ks[1], (B5, 1, T5), dtype=jnp.float32)
    w5 = jnp.arange(C5, dtype=jnp.float32).reshape(1, C5, 1) * 0.07
    ref5 = sig5 + w5 * noi5
    out5 = jax.block_until_ready(noise_injection(sig5, noi5, w5, use_pallas=True))
    assert jnp.allclose(out5, ref5, atol=1e-6), "mismatch (non-128-multiple T)"

    print("KERNEL_OK")
</pallas_src>

<mosaic_0001>
module attributes {stable_mosaic.version = 11 : i64} {
  func.func @_noise_injection_kernel(%arg0: i32, %arg1: i32, %arg2: i32, %arg3: memref<1x4x16xf32, #tpu.memory_space<vmem>>, %arg4: memref<1x1x16xf32, #tpu.memory_space<vmem>>, %arg5: memref<4x1xf32, #tpu.memory_space<vmem>>, %arg6: memref<1x4x16xf32, #tpu.memory_space<vmem>>) attributes {dimension_semantics = [#tpu.dimension_semantics<parallel>, #tpu.dimension_semantics<parallel>, #tpu.dimension_semantics<parallel>], iteration_bounds = array<i64: 2, 1, 1>, scalar_prefetch = 0 : i64, scratch_operands = 0 : i64, tpu.core_type = #tpu.core_type<tc>, window_params = [{transform_indices = @transform_0, window_bounds = array<i64: 1, 4, 16>}, {transform_indices = @transform_1, window_bounds = array<i64: 1, 1, 16>}, {transform_indices = @transform_2, window_bounds = array<i64: 4, 1>}, {transform_indices = @transform_3, window_bounds = array<i64: 1, 4, 16>}]} {
    %c0 = arith.constant 0 : index
    %c0_0 = arith.constant 0 : index
    %c0_1 = arith.constant 0 : index
    %0 = vector.load %arg3[%c0, %c0_0, %c0_1] : memref<1x4x16xf32, #tpu.memory_space<vmem>>, vector<1x4x16xf32>
    %c0_2 = arith.constant 0 : index
    %c0_3 = arith.constant 0 : index
    %1 = vector.load %arg5[%c0_2, %c0_3] : memref<4x1xf32, #tpu.memory_space<vmem>>, vector<4x1xf32>
    %c0_4 = arith.constant 0 : index
    %c0_5 = arith.constant 0 : index
    %c0_6 = arith.constant 0 : index
    %2 = vector.load %arg4[%c0_4, %c0_5, %c0_6] : memref<1x1x16xf32, #tpu.memory_space<vmem>>, vector<1x1x16xf32>
    %3 = vector.shape_cast %1 : vector<4x1xf32> to vector<1x4x1xf32>
    %4 = vector.broadcast %3 : vector<1x4x1xf32> to vector<1x4x16xf32>
    %5 = vector.broadcast %2 : vector<1x1x16xf32> to vector<1x4x16xf32>
    %6 = arith.mulf %4, %5 : vector<1x4x16xf32>
    %7 = arith.addf %0, %6 : vector<1x4x16xf32>
    %c0_7 = arith.constant 0 : index
    %c0_8 = arith.constant 0 : index
    %c0_9 = arith.constant 0 : index
    %8 = vector.load %arg6[%c0_7, %c0_8, %c0_9] : memref<1x4x16xf32, #tpu.memory_space<vmem>>, vector<1x4x16xf32>
    tpu.vector_store %arg6[%c0_7, %c0_8, %c0_9], %7 {strides = array<i32>} : memref<1x4x16xf32, #tpu.memory_space<vmem>>, vector<1x4x16xf32>,
    return
  }
  func.func @transform_0(%arg0: i32, %arg1: i32, %arg2: i32) -> (i32, i32, i32) {
    %c0_i32 = arith.constant 0 : i32
    return %arg0, %arg1, %arg2 : i32, i32, i32
  }
  func.func @transform_1(%arg0: i32, %arg1: i32, %arg2: i32) -> (i32, i32, i32) {
    %c0_i32 = arith.constant 0 : i32
    %c0_i32_0 = arith.constant 0 : i32
    return %arg0, %c0_i32, %arg2 : i32, i32, i32
  }
  func.func @transform_2(%arg0: i32, %arg1: i32, %arg2: i32) -> (i32, i32) {
    %c0_i32 = arith.constant 0 : i32
    %c0_i32_0 = arith.constant 0 : i32
    return %arg1, %c0_i32 : i32, i32
  }
  func.func @transform_3(%arg0: i32, %arg1: i32, %arg2: i32) -> (i32, i32, i32) {
    %c0_i32 = arith.constant 0 : i32
    return %arg0, %arg1, %arg2 : i32, i32, i32
  }
}

</mosaic_0001>

<bundles_post_ra>
// kernel: tpu_custom_call.1
= control target key start
LH: loop header
LB: loop body
LE: loop exit
PB: predicated region body
PF: predicated region fallthrough
CT: control target
= control target key end

     0   :  { %8 = vsyncpa [#allocation3], 0  ;;  %s799_s0 = inlined_call_operand.hbm [shape: f32[2,4,16], index: 0, kind: input, shape index: {}]   ;;  %s800_s1 = inlined_call_operand.vmem [shape: f32[2,1,16], index: 1, kind: input, shape index: {}]   ;;  %s801_s2 = inlined_call_operand.vmem [shape: f32[4,1], index: 2, kind: input, shape index: {}]   ;;  %s802_s3 = inlined_call_operand.hbm [shape: f32[2,4,16], index: 3, kind: output, shape index: {}]  }
   0x1   :  { %10 = vsyncpa [#allocation3 + $0x1], 0 }
   0x2   :  { %11 = vsyncpa [#allocation4], 0 }
   0x3   :  { %13 = vsyncpa [#allocation4 + $0x1], 0  ;;  %s619_s12 = smov 0   ;;  %s621_s13 = smov 0  }
   0x4   :  { %s623_s14 = smov 0   ;;  %s625_s15 = smov 0  }
   0x5   :  { %s627_s16 = smov 0   ;;  %s629_s17 = smov 0  }
   0x6 LB: > { %s403_s18 = sadd.s32 4294967295, %s594_s17   ;;  %s404_s19 = sadd.s32 4294967294, %s594_s17   ;;  %s594_s17 = sphi %s629_s17, %s19_s17   ;;  %s590_s16 = sphi %s627_s16, %s818_s16   ;;  %s586_s15 = sphi %s625_s15, %s817_s15   ;;  %s582_s14 = sphi %s623_s14, %s816_s14   ;;  %s578_s13 = sphi %s621_s13, %s815_s13   ;;  %s574_s12 = sphi %s619_s12, %s814_s12  }
   0x7   : > { %s38_s20 = sadd.s32 1, %s590_s16  ;;  %s49_s21 = sadd.s32 1, %s582_s14 }
   0x8   : > { %p40_p0 = scmp.ge.s32.totalorder %s38_s20, 2  ;;  %p56_p1 = scmp.ne.s32.totalorder %s582_s14, %s578_s13 }
   0x9   : > { %p57_p2 = scmp.eq.s32.totalorder %s594_s17, 0  ;;  %p62_p3 = scmp.ne.s32.totalorder %s578_s13, %s574_s12 }
   0xa   : > { %s820_s20 = smov (%p40_p0, %s38_s20), 0  ;;  %p63_p5 = scmp.eq.s32.totalorder %s403_s18, 0 }
   0xb   : > { %p660_p4 = por %p57_p2, %p56_p1  ;;  %s42_s23 = ssub.s32 %s590_s16, %s820_s20 }
   0xc   : > { %p144_p6 = scmp.eq.s32.totalorder %s403_s18, 1  ;;  %p47_p7 = scmp.eq.s32.totalorder %s42_s23, 0 }
   0xd   : > { %p666_p8 = por %p63_p5, %p62_p3  ;;  %p150_p10 = scmp.eq.s32.totalorder %s404_s19, 1 }
   0xe   : > { %p670_p9 = por %p144_p6, %p56_p1  ;;  %p430_p13 = scmp.lt.s32.totalorder %s594_s17, 2 }
   0xf   : > { %s675_s26 = scalar_select %p47_p7, %s582_s14, %s49_s21  }
  0x10   : > { %s806_s25 = scalar_select %p670_p9, 1, 0 }
  0x11   : > { %p677_p11 = por %p150_p10, %p62_p3  ;;  %s177_s28 = sand.u32 1, %s582_s14  }
  0x12   : > { %s408_s29 = sshll.u32 %s177_s28, 2  ;;  %s409_s30 = sshll.u32 %s590_s16, 6 }
  0x13   : > { %s807_s27 = scalar_select %p677_p11, 1, 0 }
  0x14   : > { %s688_s6 = scalar_lea.hbm %s799_s0, %s409_s30  ;;  %s181_s7 = scalar_lea.vmem [#allocation2], %s408_s29 }
  0x15   : > { %s190_s8 = sshll.u32 %s181_s7, 4  ;;  %p694_p0 = pnand %p430_p13, %p660_p4  ;;  %s690_s8 = int_to_ptr.vmem [resolvable:$true] %s190_s8 }
  0x16   : > { %s178_s10 = scalar_lea.sflag [#allocation3], %s177_s28  ;;  %s482_s11 = scalar_lea.hbm %s688_s6, 64 }
  0x17   : > { %p483_p3 = scmp.ne.s32.totalorder %s688_s6, %s482_s11  ;;  %p484_p5 = pneg %p694_p0 }
  0x18   : > { %s487_s21 = scalar_lea.hbm %s799_s0, 128  ;;  %p488_p4 = scmp.lt.u32.totalorder %s688_s6, %s799_s0 }
  0x19   : > { %p485_p6 = pnand %p484_p5, %p483_p3  ;;  %p489_p10 = scmp.lt.u32.totalorder %s487_s21, %s482_s11 }
  0x1a   : > { %p491_p12 = scmp.lt.u32.totalorder %s482_s11, %s688_s6 }
  0x1b   : > { %p486_p7 = pneg %p485_p6  ;;  %p490_p13 = por %p489_p10, %p488_p4 }
  0x1d   : > { %p492_p1 = por %p491_p12, %p490_p13 }
  0x1f   : > { %p493_p2 = pnand %p492_p1, %p486_p7 }
  0x21   : > { %496 = shalt.err (!%p493_p2)
}
  0x22   : > { %s497_s28 = scalar_lea.vmem %s690_s8, 64  ;;  %s596_s29 = smov [#allocation2]  }
  0x23   : > { %p498_p3 = scmp.ne.s32.totalorder %s690_s8, %s497_s28  ;;  %s502_s30 = sshll.u32 %s596_s29, 4  ;;  %s503_s30 = int_to_ptr.vmem [resolvable:$false] %s502_s30 }
  0x24   : > { %s504_s4 = scalar_lea.vmem %s503_s30, 128  ;;  %p505_p9 = scmp.lt.s32.totalorder %s690_s8, %s503_s30 }
  0x25   : > { %p500_p6 = pnand %p498_p3, %p484_p5  ;;  %p506_p4 = scmp.lt.s32.totalorder %s504_s4, %s497_s28 }
  0x27   : > { %p501_p11 = pneg %p500_p6  ;;  %p507_p10 = por %p506_p4, %p505_p9 }
  0x29   : > { %p508_p12 = pnand %p507_p10, %p501_p11 }
  0x2b   : > { %511 = shalt.err (!%p508_p12)
}
  0x2c   : > { %425 = dma.hbm_to_vmem [thread:$0]  (!%p694_p0), %s688_s6, 64, %s690_s8, %s178_s10  }
  0x2d   : > { %p809_p1 = scmp.lt.s32.totalorder %s594_s17, 3  ;;  %p810_p2 = scmp.ge.s32.totalorder %s594_s17, 1 }
  0x2f   : > { %p205_p5 = pnand %p810_p2, %p809_p1 }
  0x30   : > { %s730_s5 = sand.u32 (!%p205_p5), 1, %s578_s13  }
  0x31   : > { %208 = sbr.rel (%p205_p5) target bundleno = 205 (0xcd), region = 32  ;;  %s411_s7 = sshll.u32 (!%p205_p5), %s730_s5, 2 }
  0x32   : > { %s211_s11 = scalar_lea.sflag (!%p205_p5), [#allocation3], %s730_s5  ;;  %s214_s18 = scalar_lea.vmem (!%p205_p5), [#allocation2], %s411_s7 }
  0x38   : > { %565 = dma.done.wait (%p666_p8), %s211_s11, 64  }
  0x39   : > { %567 = vsyncadd (%p666_p8), %s211_s11, 4294967232  ;;  %v597_v0 = vmov 0   ;;  %v258_v1 = vld [vmem:[%s801_s2] sm:$0xf]  ;;  %p247_p9 = scmp.lt.s32.totalorder %s586_s15, 1  ;;  %s415_s24 = sshll.u32 %s586_s15, 6 }
  0x3a   : > { %481 = vset.pattern.permute.xlu0 %v597_v0  ;;  %v257_v4 = vld [vmem:[%s214_s18] sm:$0xf]  ;;  %s246_s22 = scalar_lea.vmem [#allocation5], %s411_s7  ;;  %vm273_vm0 = vcmask 125952   ;;  %s750_s30 = scalar_lea.hbm %s802_s3, %s415_s24 }
  0x3b   : > { %262 = vperm.xlu0 %481, %v258_v1   ;;  %s248_s9 = scalar_select %p247_p9, %s586_s15, 1 }
  0x3c   : > { %s291_s23 = sshll.u32 %s246_s22, 4  ;;  %s276_s4 = scalar_lea.sflag [#allocation4], %s730_s5  ;;  %s752_s23 = int_to_ptr.vmem [resolvable:$true] %s291_s23 }
  0x3d   : > { %s252_s21 = scalar_lea.vmem %s800_s1, %s248_s9  ;;  %s512_s11 = scalar_lea.vmem %s752_s23, 64 }
  0x3e   : > { %v413_v2 = vld [vmem:[%s252_s21] ss:$0 sm:$0xff]  ;;  %p513_p8 = scmp.ne.s32.totalorder %s752_s23, %s512_s11  ;;  %p811_p11 = scmp.ne.s32.totalorder %s806_s25, 0 }
  0x3f   : > { %s598_s15 = smov [#allocation5]  }
  0x40   : > { %p514_p0 = pnand %p513_p8, %p811_p11  ;;  %s516_s7 = sshll.u32 %s598_s15, 4  ;;  %s517_s7 = int_to_ptr.vmem [resolvable:$false] %s516_s7 }
  0x41   : > { %s518_s18 = scalar_lea.vmem %s517_s7, 128  ;;  %p519_p13 = scmp.lt.s32.totalorder %s752_s23, %s517_s7 }
  0x42   : > { %p515_p7 = pneg %p514_p0  ;;  %p520_p3 = scmp.lt.s32.totalorder %s518_s18, %s512_s11 }
  0x44   : > { %p521_p6 = por %p520_p3, %p519_p13 }
  0x46   : > { %p522_p4 = pnand %p521_p6, %p515_p7 }
  0xba   : > { %v263_v3 = vpop.permute.xlu0 %262 }
  0xbb   : > { %v271_v5 = vmul.f32 %v413_v2, %v263_v3 }
  0xbd   : > { %v272_v6 = vadd.f32 %v271_v5, %v257_v4 }
  0xbf   : > { %274 = vst.msk [vmem:[%s246_s22] sm:$0xf] %vm273_vm0, %v272_v6 }
  0xc0   : > { %525 = shalt.err (!%p522_p4)
}
  0xc1   : > { %s526_s5 = scalar_lea.hbm %s750_s30, 64  ;;  %s530_s9 = scalar_lea.hbm %s802_s3, 128 }
  0xc2   : > { %p527_p10 = scmp.ne.s32.totalorder %s750_s30, %s526_s5  ;;  %p531_p2 = scmp.lt.u32.totalorder %s750_s30, %s802_s3 }
  0xc3   : > { %p532_p5 = scmp.lt.u32.totalorder %s530_s9, %s526_s5  ;;  %p534_p8 = scmp.lt.u32.totalorder %s526_s5, %s750_s30 }
  0xc4   : > { %p528_p12 = pnand %p527_p10, %p811_p11 }
  0xc5   : > { %p533_p9 = por %p532_p5, %p531_p2 }
  0xc6   : > { %p529_p1 = pneg %p528_p12 }
  0xc7   : > { %p535_p0 = por %p534_p8, %p533_p9 }
  0xc9   : > { %p536_p7 = pnand %p535_p0, %p529_p1 }
  0xcb   : > { %539 = shalt.err (!%p536_p7)
}
  0xcc   : > { %420 = dma.vmem_to_hbm [thread:$0]  (%p811_p11), %s752_s23, 64, %s750_s30, %s276_s4  }
  0xcd PF: > { %s303_s21 = sand.u32 1, %s574_s12   ;;  %p812_p13 = scmp.ne.s32.totalorder %s807_s27, 0 }
  0xce   : > { %p813_p3 = scmp.ge.s32.totalorder %s594_s17, 2  ;;  %s304_s24 = scalar_lea.sflag [#allocation4], %s303_s21 }
  0xd0   : > { %p427_p6 = pnand %p813_p3, %p812_p13 }
  0xd2   : > { %569 = dma.done.wait (!%p427_p6), %s304_s24, 64  }
  0xd3   : > { %571 = vsyncadd (!%p427_p6), %s304_s24, 4294967232  ;;  %s19_s17 = sadd.s32 1, %s594_s17   ;;  %s814_s12 = smov %s578_s13 }
  0xd4   : > { %p16_p4 = scmp.ge.s32.totalorder %s19_s17, 4   ;;  %s815_s13 = smov %s582_s14 }
  0xd5   : > { %s816_s14 = smov %s675_s26  ;;  %s817_s15 = smov %s590_s16 }
  0xd6   : > { %s818_s16 = smov %s820_s20  ;;  %18 = sbr.rel (!%p16_p4) target bundleno = 6 (0x6), region = 83 }
  0xdd   :  { %309 = vsyncpa [#allocation3], 1 }
  0xde   :  { %311 = vsyncpa [#allocation3 + $0x1], 1 }
  0xdf   :  { %312 = vsyncpa [#allocation4], 1 }
  0xe0   :  { %314 = vsyncpa [#allocation4 + $0x1], 1 }

</bundles_post_ra>
